<compile_context>
chip_gen: v5e
topology: v5e:2x2
jax: 0.10.0
libtpu: 0.0.40
codegen_flags: <defaults>
</compile_context>

<pallas_src>
import functools

import numpy as np
import jax
import jax.numpy as jnp
from jax.experimental import pallas as pl
from jax.experimental.pallas import tpu as pltpu


# ----------------------------------------------------------------------------
# Host-side (hoisted, cached) weight construction
# ----------------------------------------------------------------------------
def _interp_weight_matrix(in_size, out_size, scale_factor):
    """(out_size, in_size) matrix matching torch F.interpolate(mode='bilinear',
    align_corners=False) for the scale_factor call path (ratio = 1/scale).
    NOTE: does NOT match torch's explicit-output-size call (ratio would be in/out)."""
    ratio = 1.0 / float(scale_factor)
    dst = np.arange(out_size, dtype=np.float64)
    src = np.maximum((dst + 0.5) * ratio - 0.5, 0.0)
    i0 = np.minimum(np.floor(src).astype(np.int64), in_size - 1)
    i1 = np.minimum(i0 + 1, in_size - 1)
    l1 = np.clip(src - i0, 0.0, 1.0)
    l0 = 1.0 - l1
    w = np.zeros((out_size, in_size), np.float64)
    rows = np.arange(out_size)
    np.add.at(w, (rows, i0), l0)
    np.add.at(w, (rows, i1), l1)
    return w


def _composed_resize_matrices(h_in, w_in, multiplier, n_stages):
    """Pre-compose per-stage interpolation matrices -> one HBM pass at runtime."""
    wh = np.eye(h_in, dtype=np.float64)
    ww = np.eye(w_in, dtype=np.float64)
    h, w = h_in, w_in
    for _ in range(n_stages):
        h2 = int(np.floor(h * multiplier))      # out = floor(in * scale), as in torch
        w2 = int(np.floor(w * multiplier))
        assert h2 > 0 and w2 > 0, "too many downscale stages for this input size"
        wh = _interp_weight_matrix(h, h2, multiplier) @ wh   # (h2, h_in)
        ww = _interp_weight_matrix(w, w2, multiplier) @ ww   # (w2, w_in)
        h, w = h2, w2
    return wh, ww, h, w


# ----------------------------------------------------------------------------
# Kernel: per grid step process a block of `batch` samples.
#   per (sample, channel):  xw = x[b,c] @ Ww^T  ;  xh_c = Wh @ xw      (MXU, bf16 in / f32 acc)
#   1x1 conv (+bias) on the downsampled tiles:  y_k = sum_c K[k,c] * xh_c + b_k   (VPU)
# ----------------------------------------------------------------------------
def _make_kernel(batch, c_in, c_out, has_conv, has_bias):
    def kernel(*refs):
        if has_conv:
            if has_bias:
                x_ref, wwt_ref, wh_ref, k_ref, b_ref, o_ref = refs
            else:
                x_ref, wwt_ref, wh_ref, k_ref, o_ref = refs
                b_ref = None
        else:
            x_ref, wwt_ref, wh_ref, o_ref = refs
            k_ref = b_ref = None

        wwt = wwt_ref[...]                       # (W_in, W_out) bf16, grid-invariant
        wh = wh_ref[...]                         # (H_out, H_in) bf16, grid-invariant

        for b in range(batch):                   # static unroll; batch is small (<=8)
            xh = []
            for c in range(c_in):
                xb = x_ref[b, c, :, :].astype(jnp.bfloat16)              # (H_in, W_in)
                xw = jnp.dot(xb, wwt, preferred_element_type=jnp.float32)  # (H_in, W_out)
                xh_c = jnp.dot(wh, xw.astype(jnp.bfloat16),
                               preferred_element_type=jnp.float32)       # (H_out, W_out)
                xh.append(xh_c)

            if not has_conv:
                for c in range(c_in):
                    o_ref[b, c, :, :] = xh[c].astype(o_ref.dtype)
            else:
                for k in range(c_out):
                    acc = xh[0] * k_ref[k, 0]
                    for c in range(1, c_in):
                        acc = acc + xh[c] * k_ref[k, c]
                    if has_bias:
                        acc = acc + b_ref[k]
                    o_ref[b, k, :, :] = acc.astype(o_ref.dtype)
    return kernel


def _pallas_forward(x, wwt, wh, kmat, bias, *, batch, c_out, h_out, w_out):
    n, c_in, h_in, w_in = x.shape
    has_conv = kmat is not None
    has_bias = bias is not None
    kernel = _make_kernel(batch, c_in, c_out, has_conv, has_bias)

    inputs = [x, wwt, wh]
    in_specs = [
        pl.BlockSpec((batch, c_in, h_in, w_in), lambda i: (i, 0, 0, 0)),
        # Grid-invariant weights: constant index_map -> fetched once, then elided.
        pl.BlockSpec((w_in, w_out), lambda i: (0, 0)),
        pl.BlockSpec((h_out, h_in), lambda i: (0, 0)),
    ]
    if has_conv:
        inputs.append(kmat)                                   # (C_out, C_in) f32 scalars
        in_specs.append(pl.BlockSpec(memory_space=pltpu.MemorySpace.SMEM))
        if has_bias:
            inputs.append(bias)                               # (C_out,) f32 scalars
            in_specs.append(pl.BlockSpec(memory_space=pltpu.MemorySpace.SMEM))

    return pl.pallas_call(
        kernel,
        out_shape=jax.ShapeDtypeStruct((n, c_out, h_out, w_out), x.dtype),
        grid=(n // batch,),
        in_specs=in_specs,
        out_specs=pl.BlockSpec((batch, c_out, h_out, w_out), lambda i: (i, 0, 0, 0)),
        compiler_params=pltpu.CompilerParams(
            dimension_semantics=("parallel",),
            vmem_limit_bytes=48 * 1024 * 1024),   # safe on v7x (64 MiB) and v5e/v6e
    )(*inputs)


# ----------------------------------------------------------------------------
# Module wrapper: hoists / caches all host-side weight construction.
# ----------------------------------------------------------------------------
class SpatialRescalerPallas:
    """Pallas-TPU SpatialRescaler (bilinear only).
    conv_weight: (C_out, C_in) or torch-style (C_out, C_in, 1, 1); conv_bias: (C_out,) or None."""

    _VMEM_BUDGET = 24 << 20   # target per-step working set when picking the sample batch
    _MAX_BATCH = 8            # bound the static unroll

    def __init__(self, n_stages=1, method='bilinear', multiplier=0.5,
                 in_channels=3, out_channels=None,
                 conv_weight=None, conv_bias=None):
        assert n_stages >= 0
        assert method == 'bilinear', "TODO(synk): only 'bilinear' is implemented"
        self.n_stages = int(n_stages)
        self.multiplier = float(multiplier)
        self.in_channels = int(in_channels)
        self.remap_output = out_channels is not None
        if self.remap_output:
            w = np.asarray(conv_weight, np.float32)
            if w.ndim == 4:
                w = w[:, :, 0, 0]
            assert w.shape == (out_channels, in_channels), w.shape
            self.out_channels = int(out_channels)
            self._kmat = jnp.asarray(w, jnp.float32)
            self._bias = (None if conv_bias is None
                          else jnp.asarray(np.asarray(conv_bias, np.float32).reshape(-1)))
        else:
            self.out_channels = self.in_channels
            self._kmat = None
            self._bias = None
        self._fn_cache = {}

    def _pick_batch(self, n, c_in, h_in, w_in, h_out, w_out, itemsize):
        c_out = self.out_channels
        per = (2 * c_in * h_in * w_in * itemsize          # double-buffered input block
               + 2 * c_out * h_out * w_out * itemsize     # double-buffered output block
               + c_in * h_out * w_out * 4                 # xh temporaries (f32)
               + c_in * h_in * (w_in + w_out) * 4)        # per-channel cast / xw temps
        best = 1
        for b in range(1, min(n, self._MAX_BATCH) + 1):
            if n % b == 0 and b * per <= self._VMEM_BUDGET:
                best = b
        return best

    def _build_forward(self, shape, dtype):
        n, c_in, h_in, w_in = shape
        assert c_in == self.in_channels, (c_in, self.in_channels)
        wh64, ww64, h_out, w_out = _composed_resize_matrices(
            h_in, w_in, self.multiplier, self.n_stages)
        wwt = jnp.asarray(ww64.T, jnp.bfloat16)            # (W_in, W_out)
        wh = jnp.asarray(wh64, jnp.bfloat16)               # (H_out, H_in)
        batch = self._pick_batch(n, c_in, h_in, w_in, h_out, w_out,
                                 np.dtype(dtype).itemsize)

        fwd = functools.partial(_pallas_forward, batch=batch,
                                c_out=self.out_channels, h_out=h_out, w_out=w_out)
        kmat, bias = self._kmat, self._bias
        if kmat is None:
            fn = jax.jit(lambda xx: fwd(xx, wwt, wh, None, None))
        elif bias is None:
            fn = jax.jit(lambda xx: fwd(xx, wwt, wh, kmat, None))
        else:
            fn = jax.jit(lambda xx: fwd(xx, wwt, wh, kmat, bias))
        return fn

    def __call__(self, x):
        if self.n_stages == 0 and not self.remap_output:
            return x
        key = (tuple(x.shape), str(x.dtype))
        fn = self._fn_cache.get(key)
        if fn is None:
            fn = self._build_forward(x.shape, x.dtype)
            self._fn_cache[key] = fn
        return fn(x)

    def encode(self, x):
        return self(x)


# ----------------------------------------------------------------------------
# Pure-JAX f32 reference of the original (staged) module math, for validation.
# ----------------------------------------------------------------------------
def _reference_forward(x, n_stages, multiplier, conv_weight, conv_bias):
    n, c, h, w = x.shape
    x = x.astype(jnp.float32)
    for _ in range(n_stages):
        h2 = int(np.floor(h * multiplier))
        w2 = int(np.floor(w * multiplier))
        wh = jnp.asarray(_interp_weight_matrix(h, h2, multiplier), jnp.float32)
        ww = jnp.asarray(_interp_weight_matrix(w, w2, multiplier), jnp.float32)
        x = jnp.einsum('oh,nchw,pw->ncop', wh, x, ww)
        h, w = h2, w2
    if conv_weight is not None:
        x = jnp.einsum('oc,nchw->nohw', jnp.asarray(conv_weight, jnp.float32), x)
        if conv_bias is not None:
            x = x + jnp.asarray(conv_bias, jnp.float32)[None, :, None, None]
    return x


if __name__ == "__main__":
    key = jax.random.PRNGKey(0)
    k_x, k_w, k_b = jax.random.split(key, 3)

    # Module config: in_channels=3 (module default), out_channels=8, multiplier=0.5.
    N, C_IN, H, W = 2, 3, 16, 16
    C_OUT = 8
    MULT = 0.5

    x = jax.random.normal(k_x, (N, C_IN, H, W), dtype=jnp.float32)
    # Conv2d(in, out, 1) weight is (C_out, C_in, 1, 1) in torch.
    w_torch = 0.2 * jax.random.normal(k_w, (C_OUT, C_IN, 1, 1), dtype=jnp.float32)
    w_oc = np.asarray(w_torch)[:, :, 0, 0]
    b = 0.1 * jax.random.normal(k_b, (C_OUT,), dtype=jnp.float32)

    TOL = dict(atol=5e-2, rtol=5e-2)   # bf16 compute vs f32 reference

    # --- Config 1: n_stages=1, 3 -> 8 channel remap, bias=False (module default) ---
    m1 = SpatialRescalerPallas(n_stages=1, multiplier=MULT, in_channels=C_IN,
                               out_channels=C_OUT, conv_weight=w_torch)
    y1 = jax.block_until_ready(m1(x))
    assert y1.shape == (N, C_OUT, H // 2, W // 2), y1.shape
    ref1 = _reference_forward(x, 1, MULT, w_oc, None)
    assert jnp.allclose(y1, ref1, **TOL), float(jnp.abs(y1 - ref1).max())

    # --- Config 2: n_stages=2, no channel remap (exercises stage composition) ---
    m2 = SpatialRescalerPallas(n_stages=2, multiplier=MULT, in_channels=C_IN)
    y2 = jax.block_until_ready(m2(x))
    assert y2.shape == (N, C_IN, H // 4, W // 4), y2.shape
    ref2 = _reference_forward(x, 2, MULT, None, None)
    assert jnp.allclose(y2, ref2, **TOL), float(jnp.abs(y2 - ref2).max())

    # --- Config 3: bias=True path ---
    m3 = SpatialRescalerPallas(n_stages=1, multiplier=MULT, in_channels=C_IN,
                               out_channels=C_OUT, conv_weight=w_torch, conv_bias=b)
    y3 = jax.block_until_ready(m3(x))
    assert y3.shape == (N, C_OUT, H // 2, W // 2), y3.shape
    ref3 = _reference_forward(x, 1, MULT, w_oc, np.asarray(b))
    assert jnp.allclose(y3, ref3, **TOL), float(jnp.abs(y3 - ref3).max())

    print("KERNEL_OK")
</pallas_src>

<mosaic_0001>
module attributes {stable_mosaic.version = 11 : i64} {
  func.func @kernel(%arg0: i32, %arg1: memref<2x3x16x16xf32, #tpu.memory_space<vmem>>, %arg2: memref<16x8xbf16, #tpu.memory_space<vmem>>, %arg3: memref<8x16xbf16, #tpu.memory_space<vmem>>, %arg4: memref<8x3xf32, #tpu.memory_space<smem>>, %arg5: memref<2x8x8x8xf32, #tpu.memory_space<vmem>>) attributes {dimension_semantics = [#tpu.dimension_semantics<parallel>], iteration_bounds = array<i64: 1>, scalar_prefetch = 0 : i64, scratch_operands = 0 : i64, tpu.core_type = #tpu.core_type<tc>, window_params = [{transform_indices = @transform_0, window_bounds = array<i64: 2, 3, 16, 16>}, {pipeline_mode = #tpu.pipeline_mode<synchronous>, transform_indices = @transform_1, window_bounds = array<i64: 16, 8>}, {pipeline_mode = #tpu.pipeline_mode<synchronous>, transform_indices = @transform_2, window_bounds = array<i64: 8, 16>}, {transform_indices = @transform_3, window_bounds = array<i64: 8, 3>}, {transform_indices = @transform_4, window_bounds = array<i64: 2, 8, 8, 8>}]} {
    %c0 = arith.constant 0 : index
    %c0_0 = arith.constant 0 : index
    %0 = vector.load %arg2[%c0, %c0_0] : memref<16x8xbf16, #tpu.memory_space<vmem>>, vector<16x8xbf16>
    %c0_1 = arith.constant 0 : index
    %c0_2 = arith.constant 0 : index
    %1 = vector.load %arg3[%c0_1, %c0_2] : memref<8x16xbf16, #tpu.memory_space<vmem>>, vector<8x16xbf16>
    %c0_3 = arith.constant 0 : index
    %c0_4 = arith.constant 0 : index
    %c0_5 = arith.constant 0 : index
    %c0_6 = arith.constant 0 : index
    %2 = vector.load %arg1[%c0_3, %c0_4, %c0_5, %c0_6] : memref<2x3x16x16xf32, #tpu.memory_space<vmem>>, vector<1x1x16x16xf32>
    %3 = vector.shape_cast %2 : vector<1x1x16x16xf32> to vector<16x16xf32>
    %4 = arith.truncf %3 : vector<16x16xf32> to vector<16x16xbf16>
    %cst = arith.constant dense<0.000000e+00> : vector<16x8xf32>
    %5 = tpu.matmul %4, %0, %cst {dimension_numbers = #tpu.dot_dimension_numbers<[1], [0], [0], [1], [0, 0, 1, 1], [], []>} : vector<16x16xbf16>, vector<16x8xbf16>, vector<16x8xf32> -> vector<16x8xf32>
    %6 = arith.truncf %5 : vector<16x8xf32> to vector<16x8xbf16>
    %cst_7 = arith.constant dense<0.000000e+00> : vector<8x8xf32>
    %7 = tpu.matmul %1, %6, %cst_7 {dimension_numbers = #tpu.dot_dimension_numbers<[1], [0], [0], [1], [0, 0, 1, 1], [], []>} : vector<8x16xbf16>, vector<16x8xbf16>, vector<8x8xf32> -> vector<8x8xf32>
    %c0_8 = arith.constant 0 : index
    %c1 = arith.constant 1 : index
    %c0_9 = arith.constant 0 : index
    %c0_10 = arith.constant 0 : index
    %8 = vector.load %arg1[%c0_8, %c1, %c0_9, %c0_10] : memref<2x3x16x16xf32, #tpu.memory_space<vmem>>, vector<1x1x16x16xf32>
    %9 = vector.shape_cast %8 : vector<1x1x16x16xf32> to vector<16x16xf32>
    %10 = arith.truncf %9 : vector<16x16xf32> to vector<16x16xbf16>
    %cst_11 = arith.constant dense<0.000000e+00> : vector<16x8xf32>
    %11 = tpu.matmul %10, %0, %cst_11 {dimension_numbers = #tpu.dot_dimension_numbers<[1], [0], [0], [1], [0, 0, 1, 1], [], []>} : vector<16x16xbf16>, vector<16x8xbf16>, vector<16x8xf32> -> vector<16x8xf32>
    %12 = arith.truncf %11 : vector<16x8xf32> to vector<16x8xbf16>
    %cst_12 = arith.constant dense<0.000000e+00> : vector<8x8xf32>
    %13 = tpu.matmul %1, %12, %cst_12 {dimension_numbers = #tpu.dot_dimension_numbers<[1], [0], [0], [1], [0, 0, 1, 1], [], []>} : vector<8x16xbf16>, vector<16x8xbf16>, vector<8x8xf32> -> vector<8x8xf32>
    %c0_13 = arith.constant 0 : index
    %c2 = arith.constant 2 : index
    %c0_14 = arith.constant 0 : index
    %c0_15 = arith.constant 0 : index
    %14 = vector.load %arg1[%c0_13, %c2, %c0_14, %c0_15] : memref<2x3x16x16xf32, #tpu.memory_space<vmem>>, vector<1x1x16x16xf32>
    %15 = vector.shape_cast %14 : vector<1x1x16x16xf32> to vector<16x16xf32>
    %16 = arith.truncf %15 : vector<16x16xf32> to vector<16x16xbf16>
    %cst_16 = arith.constant dense<0.000000e+00> : vector<16x8xf32>
    %17 = tpu.matmul %16, %0, %cst_16 {dimension_numbers = #tpu.dot_dimension_numbers<[1], [0], [0], [1], [0, 0, 1, 1], [], []>} : vector<16x16xbf16>, vector<16x8xbf16>, vector<16x8xf32> -> vector<16x8xf32>
    %18 = arith.truncf %17 : vector<16x8xf32> to vector<16x8xbf16>
    %cst_17 = arith.constant dense<0.000000e+00> : vector<8x8xf32>
    %19 = tpu.matmul %1, %18, %cst_17 {dimension_numbers = #tpu.dot_dimension_numbers<[1], [0], [0], [1], [0, 0, 1, 1], [], []>} : vector<8x16xbf16>, vector<16x8xbf16>, vector<8x8xf32> -> vector<8x8xf32>
    %c0_18 = arith.constant 0 : index
    %c0_19 = arith.constant 0 : index
    %20 = memref.load %arg4[%c0_18, %c0_19] : memref<8x3xf32, #tpu.memory_space<smem>>
    %21 = vector.broadcast %20 : f32 to vector<8x8xf32>
    %22 = arith.mulf %7, %21 : vector<8x8xf32>
    %c0_20 = arith.constant 0 : index
    %c1_21 = arith.constant 1 : index
    %23 = memref.load %arg4[%c0_20, %c1_21] : memref<8x3xf32, #tpu.memory_space<smem>>
    %24 = vector.broadcast %23 : f32 to vector<8x8xf32>
    %25 = arith.mulf %13, %24 : vector<8x8xf32>
    %26 = arith.addf %22, %25 : vector<8x8xf32>
    %c0_22 = arith.constant 0 : index
    %c2_23 = arith.constant 2 : index
    %27 = memref.load %arg4[%c0_22, %c2_23] : memref<8x3xf32, #tpu.memory_space<smem>>
    %28 = vector.broadcast %27 : f32 to vector<8x8xf32>
    %29 = arith.mulf %19, %28 : vector<8x8xf32>
    %30 = arith.addf %26, %29 : vector<8x8xf32>
    %c0_24 = arith.constant 0 : index
    %c0_25 = arith.constant 0 : index
    %c0_26 = arith.constant 0 : index
    %c0_27 = arith.constant 0 : index
    %31 = vector.load %arg5[%c0_24, %c0_25, %c0_26, %c0_27] : memref<2x8x8x8xf32, #tpu.memory_space<vmem>>, vector<1x1x8x8xf32>
    %32 = vector.shape_cast %31 : vector<1x1x8x8xf32> to vector<8x8xf32>
    %33 = vector.shape_cast %30 : vector<8x8xf32> to vector<1x1x8x8xf32>
    tpu.vector_store %arg5[%c0_24, %c0_25, %c0_26, %c0_27], %33 {strides = array<i32>} : memref<2x8x8x8xf32, #tpu.memory_space<vmem>>, vector<1x1x8x8xf32>,
    %c1_28 = arith.constant 1 : index
    %c0_29 = arith.constant 0 : index
    %34 = memref.load %arg4[%c1_28, %c0_29] : memref<8x3xf32, #tpu.memory_space<smem>>
    %35 = vector.broadcast %34 : f32 to vector<8x8xf32>
    %36 = arith.mulf %7, %35 : vector<8x8xf32>
    %c1_30 = arith.constant 1 : index
    %c1_31 = arith.constant 1 : index
    %37 = memref.load %arg4[%c1_30, %c1_31] : memref<8x3xf32, #tpu.memory_space<smem>>
    %38 = vector.broadcast %37 : f32 to vector<8x8xf32>
    %39 = arith.mulf %13, %38 : vector<8x8xf32>
    %40 = arith.addf %36, %39 : vector<8x8xf32>
    %c1_32 = arith.constant 1 : index
    %c2_33 = arith.constant 2 : index
    %41 = memref.load %arg4[%c1_32, %c2_33] : memref<8x3xf32, #tpu.memory_space<smem>>
    %42 = vector.broadcast %41 : f32 to vector<8x8xf32>
    %43 = arith.mulf %19, %42 : vector<8x8xf32>
    %44 = arith.addf %40, %43 : vector<8x8xf32>
    %c0_34 = arith.constant 0 : index
    %c1_35 = arith.constant 1 : index
    %c0_36 = arith.constant 0 : index
    %c0_37 = arith.constant 0 : index
    %45 = vector.load %arg5[%c0_34, %c1_35, %c0_36, %c0_37] : memref<2x8x8x8xf32, #tpu.memory_space<vmem>>, vector<1x1x8x8xf32>
    %46 = vector.shape_cast %45 : vector<1x1x8x8xf32> to vector<8x8xf32>
    %47 = vector.shape_cast %44 : vector<8x8xf32> to vector<1x1x8x8xf32>
    tpu.vector_store %arg5[%c0_34, %c1_35, %c0_36, %c0_37], %47 {strides = array<i32>} : memref<2x8x8x8xf32, #tpu.memory_space<vmem>>, vector<1x1x8x8xf32>,
    %c2_38 = arith.constant 2 : index
    %c0_39 = arith.constant 0 : index
    %48 = memref.load %arg4[%c2_38, %c0_39] : memref<8x3xf32, #tpu.memory_space<smem>>
    %49 = vector.broadcast %48 : f32 to vector<8x8xf32>
    %50 = arith.mulf %7, %49 : vector<8x8xf32>
    %c2_40 = arith.constant 2 : index
    %c1_41 = arith.constant 1 : index
    %51 = memref.load %arg4[%c2_40, %c1_41] : memref<8x3xf32, #tpu.memory_space<smem>>
    %52 = vector.broadcast %51 : f32 to vector<8x8xf32>
    %53 = arith.mulf %13, %52 : vector<8x8xf32>
    %54 = arith.addf %50, %53 : vector<8x8xf32>
    %c2_42 = arith.constant 2 : index
    %c2_43 = arith.constant 2 : index
    %55 = memref.load %arg4[%c2_42, %c2_43] : memref<8x3xf32, #tpu.memory_space<smem>>
    %56 = vector.broadcast %55 : f32 to vector<8x8xf32>
    %57 = arith.mulf %19, %56 : vector<8x8xf32>
    %58 = arith.addf %54, %57 : vector<8x8xf32>
    %c0_44 = arith.constant 0 : index
    %c2_45 = arith.constant 2 : index
    %c0_46 = arith.constant 0 : index
    %c0_47 = arith.constant 0 : index
    %59 = vector.load %arg5[%c0_44, %c2_45, %c0_46, %c0_47] : memref<2x8x8x8xf32, #tpu.memory_space<vmem>>, vector<1x1x8x8xf32>
    %60 = vector.shape_cast %59 : vector<1x1x8x8xf32> to vector<8x8xf32>
    %61 = vector.shape_cast %58 : vector<8x8xf32> to vector<1x1x8x8xf32>
    tpu.vector_store %arg5[%c0_44, %c2_45, %c0_46, %c0_47], %61 {strides = array<i32>} : memref<2x8x8x8xf32, #tpu.memory_space<vmem>>, vector<1x1x8x8xf32>,
    %c3 = arith.constant 3 : index
    %c0_48 = arith.constant 0 : index
    %62 = memref.load %arg4[%c3, %c0_48] : memref<8x3xf32, #tpu.memory_space<smem>>
    %63 = vector.broadcast %62 : f32 to vector<8x8xf32>
    %64 = arith.mulf %7, %63 : vector<8x8xf32>
    %c3_49 = arith.constant 3 : index
    %c1_50 = arith.constant 1 : index
    %65 = memref.load %arg4[%c3_49, %c1_50] : memref<8x3xf32, #tpu.memory_space<smem>>
    %66 = vector.broadcast %65 : f32 to vector<8x8xf32>
    %67 = arith.mulf %13, %66 : vector<8x8xf32>
    %68 = arith.addf %64, %67 : vector<8x8xf32>
    %c3_51 = arith.constant 3 : index
    %c2_52 = arith.constant 2 : index
    %69 = memref.load %arg4[%c3_51, %c2_52] : memref<8x3xf32, #tpu.memory_space<smem>>
    %70 = vector.broadcast %69 : f32 to vector<8x8xf32>
    %71 = arith.mulf %19, %70 : vector<8x8xf32>
    %72 = arith.addf %68, %71 : vector<8x8xf32>
    %c0_53 = arith.constant 0 : index
    %c3_54 = arith.constant 3 : index
    %c0_55 = arith.constant 0 : index
    %c0_56 = arith.constant 0 : index
    %73 = vector.load %arg5[%c0_53, %c3_54, %c0_55, %c0_56] : memref<2x8x8x8xf32, #tpu.memory_space<vmem>>, vector<1x1x8x8xf32>
    %74 = vector.shape_cast %73 : vector<1x1x8x8xf32> to vector<8x8xf32>
    %75 = vector.shape_cast %72 : vector<8x8xf32> to vector<1x1x8x8xf32>
    tpu.vector_store %arg5[%c0_53, %c3_54, %c0_55, %c0_56], %75 {strides = array<i32>} : memref<2x8x8x8xf32, #tpu.memory_space<vmem>>, vector<1x1x8x8xf32>,
    %c4 = arith.constant 4 : index
    %c0_57 = arith.constant 0 : index
    %76 = memref.load %arg4[%c4, %c0_57] : memref<8x3xf32, #tpu.memory_space<smem>>
    %77 = vector.broadcast %76 : f32 to vector<8x8xf32>
    %78 = arith.mulf %7, %77 : vector<8x8xf32>
    %c4_58 = arith.constant 4 : index
    %c1_59 = arith.constant 1 : index
    %79 = memref.load %arg4[%c4_58, %c1_59] : memref<8x3xf32, #tpu.memory_space<smem>>
    %80 = vector.broadcast %79 : f32 to vector<8x8xf32>
    %81 = arith.mulf %13, %80 : vector<8x8xf32>
    %82 = arith.addf %78, %81 : vector<8x8xf32>
    %c4_60 = arith.constant 4 : index
    %c2_61 = arith.constant 2 : index
    %83 = memref.load %arg4[%c4_60, %c2_61] : memref<8x3xf32, #tpu.memory_space<smem>>
    %84 = vector.broadcast %83 : f32 to vector<8x8xf32>
    %85 = arith.mulf %19, %84 : vector<8x8xf32>
    %86 = arith.addf %82, %85 : vector<8x8xf32>
    %c0_62 = arith.constant 0 : index
    %c4_63 = arith.constant 4 : index
    %c0_64 = arith.constant 0 : index
    %c0_65 = arith.constant 0 : index
    %87 = vector.load %arg5[%c0_62, %c4_63, %c0_64, %c0_65] : memref<2x8x8x8xf32, #tpu.memory_space<vmem>>, vector<1x1x8x8xf32>
    %88 = vector.shape_cast %87 : vector<1x1x8x8xf32> to vector<8x8xf32>
    %89 = vector.shape_cast %86 : vector<8x8xf32> to vector<1x1x8x8xf32>
    tpu.vector_store %arg5[%c0_62, %c4_63, %c0_64, %c0_65], %89 {strides = array<i32>} : memref<2x8x8x8xf32, #tpu.memory_space<vmem>>, vector<1x1x8x8xf32>,
    %c5 = arith.constant 5 : index
    %c0_66 = arith.constant 0 : index
    %90 = memref.load %arg4[%c5, %c0_66] : memref<8x3xf32, #tpu.memory_space<smem>>
    %91 = vector.broadcast %90 : f32 to vector<8x8xf32>
    %92 = arith.mulf %7, %91 : vector<8x8xf32>
    %c5_67 = arith.constant 5 : index
    %c1_68 = arith.constant 1 : index
    %93 = memref.load %arg4[%c5_67, %c1_68] : memref<8x3xf32, #tpu.memory_space<smem>>
    %94 = vector.broadcast %93 : f32 to vector<8x8xf32>
    %95 = arith.mulf %13, %94 : vector<8x8xf32>
    %96 = arith.addf %92, %95 : vector<8x8xf32>
    %c5_69 = arith.constant 5 : index
    %c2_70 = arith.constant 2 : index
    %97 = memref.load %arg4[%c5_69, %c2_70] : memref<8x3xf32, #tpu.memory_space<smem>>
    %98 = vector.broadcast %97 : f32 to vector<8x8xf32>
    %99 = arith.mulf %19, %98 : vector<8x8xf32>
    %100 = arith.addf %96, %99 : vector<8x8xf32>
    %c0_71 = arith.constant 0 : index
    %c5_72 = arith.constant 5 : index
    %c0_73 = arith.constant 0 : index
    %c0_74 = arith.constant 0 : index
    %101 = vector.load %arg5[%c0_71, %c5_72, %c0_73, %c0_74] : memref<2x8x8x8xf32, #tpu.memory_space<vmem>>, vector<1x1x8x8xf32>
    %102 = vector.shape_cast %101 : vector<1x1x8x8xf32> to vector<8x8xf32>
    %103 = vector.shape_cast %100 : vector<8x8xf32> to vector<1x1x8x8xf32>
    tpu.vector_store %arg5[%c0_71, %c5_72, %c0_73, %c0_74], %103 {strides = array<i32>} : memref<2x8x8x8xf32, #tpu.memory_space<vmem>>, vector<1x1x8x8xf32>,
    %c6 = arith.constant 6 : index
    %c0_75 = arith.constant 0 : index
    %104 = memref.load %arg4[%c6, %c0_75] : memref<8x3xf32, #tpu.memory_space<smem>>
    %105 = vector.broadcast %104 : f32 to vector<8x8xf32>
    %106 = arith.mulf %7, %105 : vector<8x8xf32>
    %c6_76 = arith.constant 6 : index
    %c1_77 = arith.constant 1 : index
    %107 = memref.load %arg4[%c6_76, %c1_77] : memref<8x3xf32, #tpu.memory_space<smem>>
    %108 = vector.broadcast %107 : f32 to vector<8x8xf32>
    %109 = arith.mulf %13, %108 : vector<8x8xf32>
    %110 = arith.addf %106, %109 : vector<8x8xf32>
    %c6_78 = arith.constant 6 : index
    %c2_79 = arith.constant 2 : index
    %111 = memref.load %arg4[%c6_78, %c2_79] : memref<8x3xf32, #tpu.memory_space<smem>>
    %112 = vector.broadcast %111 : f32 to vector<8x8xf32>
    %113 = arith.mulf %19, %112 : vector<8x8xf32>
    %114 = arith.addf %110, %113 : vector<8x8xf32>
    %c0_80 = arith.constant 0 : index
    %c6_81 = arith.constant 6 : index
    %c0_82 = arith.constant 0 : index
    %c0_83 = arith.constant 0 : index
    %115 = vector.load %arg5[%c0_80, %c6_81, %c0_82, %c0_83] : memref<2x8x8x8xf32, #tpu.memory_space<vmem>>, vector<1x1x8x8xf32>
    %116 = vector.shape_cast %115 : vector<1x1x8x8xf32> to vector<8x8xf32>
    %117 = vector.shape_cast %114 : vector<8x8xf32> to vector<1x1x8x8xf32>
    tpu.vector_store %arg5[%c0_80, %c6_81, %c0_82, %c0_83], %117 {strides = array<i32>} : memref<2x8x8x8xf32, #tpu.memory_space<vmem>>, vector<1x1x8x8xf32>,
    %c7 = arith.constant 7 : index
    %c0_84 = arith.constant 0 : index
    %118 = memref.load %arg4[%c7, %c0_84] : memref<8x3xf32, #tpu.memory_space<smem>>
    %119 = vector.broadcast %118 : f32 to vector<8x8xf32>
    %120 = arith.mulf %7, %119 : vector<8x8xf32>
    %c7_85 = arith.constant 7 : index
    %c1_86 = arith.constant 1 : index
    %121 = memref.load %arg4[%c7_85, %c1_86] : memref<8x3xf32, #tpu.memory_space<smem>>
    %122 = vector.broadcast %121 : f32 to vector<8x8xf32>
    %123 = arith.mulf %13, %122 : vector<8x8xf32>
    %124 = arith.addf %120, %123 : vector<8x8xf32>
    %c7_87 = arith.constant 7 : index
    %c2_88 = arith.constant 2 : index
    %125 = memref.load %arg4[%c7_87, %c2_88] : memref<8x3xf32, #tpu.memory_space<smem>>
    %126 = vector.broadcast %125 : f32 to vector<8x8xf32>
    %127 = arith.mulf %19, %126 : vector<8x8xf32>
    %128 = arith.addf %124, %127 : vector<8x8xf32>
    %c0_89 = arith.constant 0 : index
    %c7_90 = arith.constant 7 : index
    %c0_91 = arith.constant 0 : index
    %c0_92 = arith.constant 0 : index
    %129 = vector.load %arg5[%c0_89, %c7_90, %c0_91, %c0_92] : memref<2x8x8x8xf32, #tpu.memory_space<vmem>>, vector<1x1x8x8xf32>
    %130 = vector.shape_cast %129 : vector<1x1x8x8xf32> to vector<8x8xf32>
    %131 = vector.shape_cast %128 : vector<8x8xf32> to vector<1x1x8x8xf32>
    tpu.vector_store %arg5[%c0_89, %c7_90, %c0_91, %c0_92], %131 {strides = array<i32>} : memref<2x8x8x8xf32, #tpu.memory_space<vmem>>, vector<1x1x8x8xf32>,
    %c1_93 = arith.constant 1 : index
    %c0_94 = arith.constant 0 : index
    %c0_95 = arith.constant 0 : index
    %c0_96 = arith.constant 0 : index
    %132 = vector.load %arg1[%c1_93, %c0_94, %c0_95, %c0_96] : memref<2x3x16x16xf32, #tpu.memory_space<vmem>>, vector<1x1x16x16xf32>
    %133 = vector.shape_cast %132 : vector<1x1x16x16xf32> to vector<16x16xf32>
    %134 = arith.truncf %133 : vector<16x16xf32> to vector<16x16xbf16>
    %cst_97 = arith.constant dense<0.000000e+00> : vector<16x8xf32>
    %135 = tpu.matmul %134, %0, %cst_97 {dimension_numbers = #tpu.dot_dimension_numbers<[1], [0], [0], [1], [0, 0, 1, 1], [], []>} : vector<16x16xbf16>, vector<16x8xbf16>, vector<16x8xf32> -> vector<16x8xf32>
    %136 = arith.truncf %135 : vector<16x8xf32> to vector<16x8xbf16>
    %cst_98 = arith.constant dense<0.000000e+00> : vector<8x8xf32>
    %137 = tpu.matmul %1, %136, %cst_98 {dimension_numbers = #tpu.dot_dimension_numbers<[1], [0], [0], [1], [0, 0, 1, 1], [], []>} : vector<8x16xbf16>, vector<16x8xbf16>, vector<8x8xf32> -> vector<8x8xf32>
    %c1_99 = arith.constant 1 : index
    %c1_100 = arith.constant 1 : index
    %c0_101 = arith.constant 0 : index
    %c0_102 = arith.constant 0 : index
    %138 = vector.load %arg1[%c1_99, %c1_100, %c0_101, %c0_102] : memref<2x3x16x16xf32, #tpu.memory_space<vmem>>, vector<1x1x16x16xf32>
    %139 = vector.shape_cast %138 : vector<1x1x16x16xf32> to vector<16x16xf32>
    %140 = arith.truncf %139 : vector<16x16xf32> to vector<16x16xbf16>
    %cst_103 = arith.constant dense<0.000000e+00> : vector<16x8xf32>
    %141 = tpu.matmul %140, %0, %cst_103 {dimension_numbers = #tpu.dot_dimension_numbers<[1], [0], [0], [1], [0, 0, 1, 1], [], []>} : vector<16x16xbf16>, vector<16x8xbf16>, vector<16x8xf32> -> vector<16x8xf32>
    %142 = arith.truncf %141 : vector<16x8xf32> to vector<16x8xbf16>
    %cst_104 = arith.constant dense<0.000000e+00> : vector<8x8xf32>
    %143 = tpu.matmul %1, %142, %cst_104 {dimension_numbers = #tpu.dot_dimension_numbers<[1], [0], [0], [1], [0, 0, 1, 1], [], []>} : vector<8x16xbf16>, vector<16x8xbf16>, vector<8x8xf32> -> vector<8x8xf32>
    %c1_105 = arith.constant 1 : index
    %c2_106 = arith.constant 2 : index
    %c0_107 = arith.constant 0 : index
    %c0_108 = arith.constant 0 : index
    %144 = vector.load %arg1[%c1_105, %c2_106, %c0_107, %c0_108] : memref<2x3x16x16xf32, #tpu.memory_space<vmem>>, vector<1x1x16x16xf32>
    %145 = vector.shape_cast %144 : vector<1x1x16x16xf32> to vector<16x16xf32>
    %146 = arith.truncf %145 : vector<16x16xf32> to vector<16x16xbf16>
    %cst_109 = arith.constant dense<0.000000e+00> : vector<16x8xf32>
    %147 = tpu.matmul %146, %0, %cst_109 {dimension_numbers = #tpu.dot_dimension_numbers<[1], [0], [0], [1], [0, 0, 1, 1], [], []>} : vector<16x16xbf16>, vector<16x8xbf16>, vector<16x8xf32> -> vector<16x8xf32>
    %148 = arith.truncf %147 : vector<16x8xf32> to vector<16x8xbf16>
    %cst_110 = arith.constant dense<0.000000e+00> : vector<8x8xf32>
    %149 = tpu.matmul %1, %148, %cst_110 {dimension_numbers = #tpu.dot_dimension_numbers<[1], [0], [0], [1], [0, 0, 1, 1], [], []>} : vector<8x16xbf16>, vector<16x8xbf16>, vector<8x8xf32> -> vector<8x8xf32>
    %c0_111 = arith.constant 0 : index
    %c0_112 = arith.constant 0 : index
    %150 = memref.load %arg4[%c0_111, %c0_112] : memref<8x3xf32, #tpu.memory_space<smem>>
    %151 = vector.broadcast %150 : f32 to vector<8x8xf32>
    %152 = arith.mulf %137, %151 : vector<8x8xf32>
    %c0_113 = arith.constant 0 : index
    %c1_114 = arith.constant 1 : index
    %153 = memref.load %arg4[%c0_113, %c1_114] : memref<8x3xf32, #tpu.memory_space<smem>>
    %154 = vector.broadcast %153 : f32 to vector<8x8xf32>
    %155 = arith.mulf %143, %154 : vector<8x8xf32>
    %156 = arith.addf %152, %155 : vector<8x8xf32>
    %c0_115 = arith.constant 0 : index
    %c2_116 = arith.constant 2 : index
    %157 = memref.load %arg4[%c0_115, %c2_116] : memref<8x3xf32, #tpu.memory_space<smem>>
    %158 = vector.broadcast %157 : f32 to vector<8x8xf32>
    %159 = arith.mulf %149, %158 : vector<8x8xf32>
    %160 = arith.addf %156, %159 : vector<8x8xf32>
    %c1_117 = arith.constant 1 : index
    %c0_118 = arith.constant 0 : index
    %c0_119 = arith.constant 0 : index
    %c0_120 = arith.constant 0 : index
    %161 = vector.load %arg5[%c1_117, %c0_118, %c0_119, %c0_120] : memref<2x8x8x8xf32, #tpu.memory_space<vmem>>, vector<1x1x8x8xf32>
    %162 = vector.shape_cast %161 : vector<1x1x8x8xf32> to vector<8x8xf32>
    %163 = vector.shape_cast %160 : vector<8x8xf32> to vector<1x1x8x8xf32>
    tpu.vector_store %arg5[%c1_117, %c0_118, %c0_119, %c0_120], %163 {strides = array<i32>} : memref<2x8x8x8xf32, #tpu.memory_space<vmem>>, vector<1x1x8x8xf32>,
    %c1_121 = arith.constant 1 : index
    %c0_122 = arith.constant 0 : index
    %164 = memref.load %arg4[%c1_121, %c0_122] : memref<8x3xf32, #tpu.memory_space<smem>>
    %165 = vector.broadcast %164 : f32 to vector<8x8xf32>
    %166 = arith.mulf %137, %165 : vector<8x8xf32>
    %c1_123 = arith.constant 1 : index
    %c1_124 = arith.constant 1 : index
    %167 = memref.load %arg4[%c1_123, %c1_124] : memref<8x3xf32, #tpu.memory_space<smem>>
    %168 = vector.broadcast %167 : f32 to vector<8x8xf32>
    %169 = arith.mulf %143, %168 : vector<8x8xf32>
    %170 = arith.addf %166, %169 : vector<8x8xf32>
    %c1_125 = arith.constant 1 : index
    %c2_126 = arith.constant 2 : index
    %171 = memref.load %arg4[%c1_125, %c2_126] : memref<8x3xf32, #tpu.memory_space<smem>>
    %172 = vector.broadcast %171 : f32 to vector<8x8xf32>
    %173 = arith.mulf %149, %172 : vector<8x8xf32>
    %174 = arith.addf %170, %173 : vector<8x8xf32>
    %c1_127 = arith.constant 1 : index
    %c1_128 = arith.constant 1 : index
    %c0_129 = arith.constant 0 : index
    %c0_130 = arith.constant 0 : index
    %175 = vector.load %arg5[%c1_127, %c1_128, %c0_129, %c0_130] : memref<2x8x8x8xf32, #tpu.memory_space<vmem>>, vector<1x1x8x8xf32>
    %176 = vector.shape_cast %175 : vector<1x1x8x8xf32> to vector<8x8xf32>
    %177 = vector.shape_cast %174 : vector<8x8xf32> to vector<1x1x8x8xf32>
    tpu.vector_store %arg5[%c1_127, %c1_128, %c0_129, %c0_130], %177 {strides = array<i32>} : memref<2x8x8x8xf32, #tpu.memory_space<vmem>>, vector<1x1x8x8xf32>,
    %c2_131 = arith.constant 2 : index
    %c0_132 = arith.constant 0 : index
    %178 = memref.load %arg4[%c2_131, %c0_132] : memref<8x3xf32, #tpu.memory_space<smem>>
    %179 = vector.broadcast %178 : f32 to vector<8x8xf32>
    %180 = arith.mulf %137, %179 : vector<8x8xf32>
    %c2_133 = arith.constant 2 : index
    %c1_134 = arith.constant 1 : index
    %181 = memref.load %arg4[%c2_133, %c1_134] : memref<8x3xf32, #tpu.memory_space<smem>>
    %182 = vector.broadcast %181 : f32 to vector<8x8xf32>
    %183 = arith.mulf %143, %182 : vector<8x8xf32>
    %184 = arith.addf %180, %183 : vector<8x8xf32>
    %c2_135 = arith.constant 2 : index
    %c2_136 = arith.constant 2 : index
    %185 = memref.load %arg4[%c2_135, %c2_136] : memref<8x3xf32, #tpu.memory_space<smem>>
    %186 = vector.broadcast %185 : f32 to vector<8x8xf32>
    %187 = arith.mulf %149, %186 : vector<8x8xf32>
    %188 = arith.addf %184, %187 : vector<8x8xf32>
    %c1_137 = arith.constant 1 : index
    %c2_138 = arith.constant 2 : index
    %c0_139 = arith.constant 0 : index
    %c0_140 = arith.constant 0 : index
    %189 = vector.load %arg5[%c1_137, %c2_138, %c0_139, %c0_140] : memref<2x8x8x8xf32, #tpu.memory_space<vmem>>, vector<1x1x8x8xf32>
    %190 = vector.shape_cast %189 : vector<1x1x8x8xf32> to vector<8x8xf32>
    %191 = vector.shape_cast %188 : vector<8x8xf32> to vector<1x1x8x8xf32>
    tpu.vector_store %arg5[%c1_137, %c2_138, %c0_139, %c0_140], %191 {strides = array<i32>} : memref<2x8x8x8xf32, #tpu.memory_space<vmem>>, vector<1x1x8x8xf32>,
    %c3_141 = arith.constant 3 : index
    %c0_142 = arith.constant 0 : index
    %192 = memref.load %arg4[%c3_141, %c0_142] : memref<8x3xf32, #tpu.memory_space<smem>>
    %193 = vector.broadcast %192 : f32 to vector<8x8xf32>
    %194 = arith.mulf %137, %193 : vector<8x8xf32>
    %c3_143 = arith.constant 3 : index
    %c1_144 = arith.constant 1 : index
    %195 = memref.load %arg4[%c3_143, %c1_144] : memref<8x3xf32, #tpu.memory_space<smem>>
    %196 = vector.broadcast %195 : f32 to vector<8x8xf32>
    %197 = arith.mulf %143, %196 : vector<8x8xf32>
    %198 = arith.addf %194, %197 : vector<8x8xf32>
    %c3_145 = arith.constant 3 : index
    %c2_146 = arith.constant 2 : index
    %199 = memref.load %arg4[%c3_145, %c2_146] : memref<8x3xf32, #tpu.memory_space<smem>>
    %200 = vector.broadcast %199 : f32 to vector<8x8xf32>
    %201 = arith.mulf %149, %200 : vector<8x8xf32>
    %202 = arith.addf %198, %201 : vector<8x8xf32>
    %c1_147 = arith.constant 1 : index
    %c3_148 = arith.constant 3 : index
    %c0_149 = arith.constant 0 : index
    %c0_150 = arith.constant 0 : index
    %203 = vector.load %arg5[%c1_147, %c3_148, %c0_149, %c0_150] : memref<2x8x8x8xf32, #tpu.memory_space<vmem>>, vector<1x1x8x8xf32>
    %204 = vector.shape_cast %203 : vector<1x1x8x8xf32> to vector<8x8xf32>
    %205 = vector.shape_cast %202 : vector<8x8xf32> to vector<1x1x8x8xf32>
    tpu.vector_store %arg5[%c1_147, %c3_148, %c0_149, %c0_150], %205 {strides = array<i32>} : memref<2x8x8x8xf32, #tpu.memory_space<vmem>>, vector<1x1x8x8xf32>,
    %c4_151 = arith.constant 4 : index
    %c0_152 = arith.constant 0 : index
    %206 = memref.load %arg4[%c4_151, %c0_152] : memref<8x3xf32, #tpu.memory_space<smem>>
    %207 = vector.broadcast %206 : f32 to vector<8x8xf32>
    %208 = arith.mulf %137, %207 : vector<8x8xf32>
    %c4_153 = arith.constant 4 : index
    %c1_154 = arith.constant 1 : index
    %209 = memref.load %arg4[%c4_153, %c1_154] : memref<8x3xf32, #tpu.memory_space<smem>>
    %210 = vector.broadcast %209 : f32 to vector<8x8xf32>
    %211 = arith.mulf %143, %210 : vector<8x8xf32>
    %212 = arith.addf %208, %211 : vector<8x8xf32>
    %c4_155 = arith.constant 4 : index
    %c2_156 = arith.constant 2 : index
    %213 = memref.load %arg4[%c4_155, %c2_156] : memref<8x3xf32, #tpu.memory_space<smem>>
    %214 = vector.broadcast %213 : f32 to vector<8x8xf32>
    %215 = arith.mulf %149, %214 : vector<8x8xf32>
    %216 = arith.addf %212, %215 : vector<8x8xf32>
    %c1_157 = arith.constant 1 : index
    %c4_158 = arith.constant 4 : index
    %c0_159 = arith.constant 0 : index
    %c0_160 = arith.constant 0 : index
    %217 = vector.load %arg5[%c1_157, %c4_158, %c0_159, %c0_160] : memref<2x8x8x8xf32, #tpu.memory_space<vmem>>, vector<1x1x8x8xf32>
    %218 = vector.shape_cast %217 : vector<1x1x8x8xf32> to vector<8x8xf32>
    %219 = vector.shape_cast %216 : vector<8x8xf32> to vector<1x1x8x8xf32>
    tpu.vector_store %arg5[%c1_157, %c4_158, %c0_159, %c0_160], %219 {strides = array<i32>} : memref<2x8x8x8xf32, #tpu.memory_space<vmem>>, vector<1x1x8x8xf32>,
    %c5_161 = arith.constant 5 : index
    %c0_162 = arith.constant 0 : index
    %220 = memref.load %arg4[%c5_161, %c0_162] : memref<8x3xf32, #tpu.memory_space<smem>>
    %221 = vector.broadcast %220 : f32 to vector<8x8xf32>
    %222 = arith.mulf %137, %221 : vector<8x8xf32>
    %c5_163 = arith.constant 5 : index
    %c1_164 = arith.constant 1 : index
    %223 = memref.load %arg4[%c5_163, %c1_164] : memref<8x3xf32, #tpu.memory_space<smem>>
    %224 = vector.broadcast %223 : f32 to vector<8x8xf32>
    %225 = arith.mulf %143, %224 : vector<8x8xf32>
    %226 = arith.addf %222, %225 : vector<8x8xf32>
    %c5_165 = arith.constant 5 : index
    %c2_166 = arith.constant 2 : index
    %227 = memref.load %arg4[%c5_165, %c2_166] : memref<8x3xf32, #tpu.memory_space<smem>>
    %228 = vector.broadcast %227 : f32 to vector<8x8xf32>
    %229 = arith.mulf %149, %228 : vector<8x8xf32>
    %230 = arith.addf %226, %229 : vector<8x8xf32>
    %c1_167 = arith.constant 1 : index
    %c5_168 = arith.constant 5 : index
    %c0_169 = arith.constant 0 : index
    %c0_170 = arith.constant 0 : index
    %231 = vector.load %arg5[%c1_167, %c5_168, %c0_169, %c0_170] : memref<2x8x8x8xf32, #tpu.memory_space<vmem>>, vector<1x1x8x8xf32>
    %232 = vector.shape_cast %231 : vector<1x1x8x8xf32> to vector<8x8xf32>
    %233 = vector.shape_cast %230 : vector<8x8xf32> to vector<1x1x8x8xf32>
    tpu.vector_store %arg5[%c1_167, %c5_168, %c0_169, %c0_170], %233 {strides = array<i32>} : memref<2x8x8x8xf32, #tpu.memory_space<vmem>>, vector<1x1x8x8xf32>,
    %c6_171 = arith.constant 6 : index
    %c0_172 = arith.constant 0 : index
    %234 = memref.load %arg4[%c6_171, %c0_172] : memref<8x3xf32, #tpu.memory_space<smem>>
    %235 = vector.broadcast %234 : f32 to vector<8x8xf32>
    %236 = arith.mulf %137, %235 : vector<8x8xf32>
    %c6_173 = arith.constant 6 : index
    %c1_174 = arith.constant 1 : index
    %237 = memref.load %arg4[%c6_173, %c1_174] : memref<8x3xf32, #tpu.memory_space<smem>>
    %238 = vector.broadcast %237 : f32 to vector<8x8xf32>
    %239 = arith.mulf %143, %238 : vector<8x8xf32>
    %240 = arith.addf %236, %239 : vector<8x8xf32>
    %c6_175 = arith.constant 6 : index
    %c2_176 = arith.constant 2 : index
    %241 = memref.load %arg4[%c6_175, %c2_176] : memref<8x3xf32, #tpu.memory_space<smem>>
    %242 = vector.broadcast %241 : f32 to vector<8x8xf32>
    %243 = arith.mulf %149, %242 : vector<8x8xf32>
    %244 = arith.addf %240, %243 : vector<8x8xf32>
    %c1_177 = arith.constant 1 : index
    %c6_178 = arith.constant 6 : index
    %c0_179 = arith.constant 0 : index
    %c0_180 = arith.constant 0 : index
    %245 = vector.load %arg5[%c1_177, %c6_178, %c0_179, %c0_180] : memref<2x8x8x8xf32, #tpu.memory_space<vmem>>, vector<1x1x8x8xf32>
    %246 = vector.shape_cast %245 : vector<1x1x8x8xf32> to vector<8x8xf32>
    %247 = vector.shape_cast %244 : vector<8x8xf32> to vector<1x1x8x8xf32>
    tpu.vector_store %arg5[%c1_177, %c6_178, %c0_179, %c0_180], %247 {strides = array<i32>} : memref<2x8x8x8xf32, #tpu.memory_space<vmem>>, vector<1x1x8x8xf32>,
    %c7_181 = arith.constant 7 : index
    %c0_182 = arith.constant 0 : index
    %248 = memref.load %arg4[%c7_181, %c0_182] : memref<8x3xf32, #tpu.memory_space<smem>>
    %249 = vector.broadcast %248 : f32 to vector<8x8xf32>
    %250 = arith.mulf %137, %249 : vector<8x8xf32>
    %c7_183 = arith.constant 7 : index
    %c1_184 = arith.constant 1 : index
    %251 = memref.load %arg4[%c7_183, %c1_184] : memref<8x3xf32, #tpu.memory_space<smem>>
    %252 = vector.broadcast %251 : f32 to vector<8x8xf32>
    %253 = arith.mulf %143, %252 : vector<8x8xf32>
    %254 = arith.addf %250, %253 : vector<8x8xf32>
    %c7_185 = arith.constant 7 : index
    %c2_186 = arith.constant 2 : index
    %255 = memref.load %arg4[%c7_185, %c2_186] : memref<8x3xf32, #tpu.memory_space<smem>>
    %256 = vector.broadcast %255 : f32 to vector<8x8xf32>
    %257 = arith.mulf %149, %256 : vector<8x8xf32>
    %258 = arith.addf %254, %257 : vector<8x8xf32>
    %c1_187 = arith.constant 1 : index
    %c7_188 = arith.constant 7 : index
    %c0_189 = arith.constant 0 : index
    %c0_190 = arith.constant 0 : index
    %259 = vector.load %arg5[%c1_187, %c7_188, %c0_189, %c0_190] : memref<2x8x8x8xf32, #tpu.memory_space<vmem>>, vector<1x1x8x8xf32>
    %260 = vector.shape_cast %259 : vector<1x1x8x8xf32> to vector<8x8xf32>
    %261 = vector.shape_cast %258 : vector<8x8xf32> to vector<1x1x8x8xf32>
    tpu.vector_store %arg5[%c1_187, %c7_188, %c0_189, %c0_190], %261 {strides = array<i32>} : memref<2x8x8x8xf32, #tpu.memory_space<vmem>>, vector<1x1x8x8xf32>,
    return
  }
  func.func @transform_0(%arg0: i32) -> (i32, i32, i32, i32) {
    %c0_i32 = arith.constant 0 : i32
    %c0_i32_0 = arith.constant 0 : i32
    %c0_i32_1 = arith.constant 0 : i32
    %c0_i32_2 = arith.constant 0 : i32
    return %arg0, %c0_i32, %c0_i32_0, %c0_i32_1 : i32, i32, i32, i32
  }
  func.func @transform_1(%arg0: i32) -> (i32, i32) {
    %c0_i32 = arith.constant 0 : i32
    %c0_i32_0 = arith.constant 0 : i32
    %c0_i32_1 = arith.constant 0 : i32
    return %c0_i32, %c0_i32_0 : i32, i32
  }
  func.func @transform_2(%arg0: i32) -> (i32, i32) {
    %c0_i32 = arith.constant 0 : i32
    %c0_i32_0 = arith.constant 0 : i32
    %c0_i32_1 = arith.constant 0 : i32
    return %c0_i32, %c0_i32_0 : i32, i32
  }
  func.func @transform_3(%arg0: i32) -> (i32, i32) {
    %c0_i32 = arith.constant 0 : i32
    %c0_i32_0 = arith.constant 0 : i32
    %c0_i32_1 = arith.constant 0 : i32
    return %c0_i32, %c0_i32_0 : i32, i32
  }
  func.func @transform_4(%arg0: i32) -> (i32, i32, i32, i32) {
    %c0_i32 = arith.constant 0 : i32
    %c0_i32_0 = arith.constant 0 : i32
    %c0_i32_1 = arith.constant 0 : i32
    %c0_i32_2 = arith.constant 0 : i32
    return %arg0, %c0_i32, %c0_i32_0, %c0_i32_1 : i32, i32, i32, i32
  }
}

</mosaic_0001>

<bundles_post_ra>
// kernel: _lambda_.1
= control target key start
LH: loop header
LB: loop body
LE: loop exit
PB: predicated region body
PF: predicated region fallthrough
CT: control target
= control target key end

     0   :  { %9 = vsyncpa [#allocation3], 0  ;;  %s967_s0 = inlined_call_operand.hbm [shape: f32[2,3,16,16], index: 0, kind: input, shape index: {}]   ;;  %s968_s1 = inlined_call_operand.hbm [shape: bf16[16,8], index: 1, kind: input, shape index: {}]   ;;  %s969_s2 = inlined_call_operand.hbm [shape: bf16[8,16], index: 2, kind: input, shape index: {}]   ;;  %s970_s3 = inlined_call_operand.hbm [shape: f32[8,3], index: 3, kind: input, shape index: {}]   ;;  %s971_s4 = inlined_call_operand.hbm [shape: f32[2,8,8,8], index: 4, kind: output, shape index: {}]  }
   0x1   :  { %10 = vsyncpa [#allocation7], 0 }
   0x2   :  { %11 = vsyncpa [#allocation5], 0  ;;  %s30_s17 = sshll.u32 %s968_s1, 4  ;;  %s31_s17 = int_to_ptr.hbm [resolvable:$true] %s30_s17 }
   0x3   :  { %12 = vsyncpa [#allocation4], 0  ;;  %s716_s18 = smov [#allocation6]   ;;  %s17_s22 = sshll.u32 %s967_s0, 4  ;;  %s18_s22 = int_to_ptr.hbm [resolvable:$true] %s17_s22 }
   0x4   :  { %s32_s19 = sshll.u32 %s716_s18, 4  ;;  %s717_s23 = smov 64   ;;  %s33_s19 = int_to_ptr.vmem [resolvable:$true] %s32_s19 }
   0x5   :  { %s718_s24 = smov 4   ;;  %s719_s25 = smov [#allocation2]  }
   0x6   :  { %38 = dma.hbm_to_vmem [thread:$0]  %s31_s17, 128, %s33_s19, [#allocation7], %s717_s23, %s717_s23, %s718_s24  }
   0x7   :  { %s19_s26 = sshll.u32 %s719_s25, 4  ;;  %s720_s27 = smov 128   ;;  %s20_s26 = int_to_ptr.vmem [resolvable:$true] %s19_s26 }
   0x8   :  { %s721_s28 = smov 8   ;;  %s44_s30 = sshll.u32 %s969_s2, 4  ;;  %s45_s30 = int_to_ptr.hbm [resolvable:$true] %s44_s30 }
   0x9   :  { %25 = dma.hbm_to_vmem [thread:$0]  %s18_s22, 1536, %s20_s26, [#allocation3], %s720_s27, %s720_s27, %s721_s28  }
   0xa   :  { %s722_s5 = smov [#allocation8]   ;;  %s55_s8 = sshll.u32 %s970_s3, 4  ;;  %s56_s8 = int_to_ptr.hbm [resolvable:$true] %s55_s8 }
   0xb   :  { %s46_s0 = sshll.u32 %s722_s5, 4  ;;  %s723_s9 = smov [#allocation9]   ;;  %s47_s0 = int_to_ptr.vmem [resolvable:$true] %s46_s0 }
   0xc   :  { %49 = dma.hbm_to_vmem [thread:$0]  %s45_s30, 64, %s47_s0, [#allocation7]  }
   0xd   :  { %58 = dma.hbm_to_smem %s56_s8, 128, %s723_s9, [#allocation5]  }
   0xe   :  { %708 = dma.done.wait [#allocation3], 1536  }
   0xf   :  { %709 = vsyncadd [#allocation3], 4294965760 }
  0x10   :  { %710 = dma.done.wait [#allocation7], 192  }
  0x11   :  { %711 = vsyncadd [#allocation7], 4294967104 }
  0x12   :  { %712 = dma.done.wait [#allocation5], 128  }
  0x13   :  { %713 = vsyncadd [#allocation5], 4294967168 }
  0x14   :  { %75 = sfence }
  0x15   :  { %v590_v0 = vld [vmem:[#allocation6] sm:$0xff]  ;;  %v125_v1 = vld [vmem:[#allocation2 + $0x10] sm:$0xff]  ;;  %v126_v2 = vld [vmem:[#allocation2 + $0x18] sm:$0xff]  ;;  %vm89_vm0 = vcmask 130048   ;;  %s777_s2 = sld [smem:[#allocation9]]  ;;  %vm205_vm1 = vcmask 64512  }
  0x16   :  { %v127_v3 = vpack.c.bf16 %v126_v2, %v125_v1  ;;  %v80_v4 = vld [vmem:[#allocation2] sm:$0xff]  ;;  %v81_v5 = vld [vmem:[#allocation2 + $0x8] sm:$0xff]  ;;  %138 = vmatpush.bf16.msra.mxu2 %v590_v0  ;;  %100 = vmatpush.bf16.msra.mxu0 %v590_v0  ;;  %v299_v7 = vld [vmem:[#allocation2 + $0x30] sm:$0xff]  ;;  %s779_s3 = sld [smem:[#allocation9 + $0x80]]  ;;  %s724_s6 = smov [#allocation10]  }
  0x17   :  { %v82_v6 = vpack.c.bf16 %v81_v5, %v80_v4  ;;  %v300_v8 = vld [vmem:[#allocation2 + $0x38] sm:$0xff]  ;;  %v160_v9 = vld [vmem:[#allocation2 + $0x20] sm:$0xff]  ;;  %v161_v10 = vld [vmem:[#allocation2 + $0x28] sm:$0xff]  ;;  %s781_s10 = sld [smem:[#allocation9 + $0x100]]  ;;  %s511_s7 = sshll.u32 %s724_s6, 4  ;;  %s512_s7 = int_to_ptr.vmem [resolvable:$true] %s511_s7 }
  0x18   :  { %v301_v11 = vpack.c.bf16 %v300_v8, %v299_v7  ;;  %v162_v12 = vpack.c.bf16 %v161_v10, %v160_v9  ;;  %v369_v13 = vld [vmem:[#allocation2 + $0x50] sm:$0xff]  ;;  %v370_v14 = vld [vmem:[#allocation2 + $0x58] sm:$0xff]  ;;  %v334_v15 = vld [vmem:[#allocation2 + $0x40] sm:$0xff]  ;;  %s783_s11 = sld [smem:[#allocation9 + $0x180]] }
  0x19   :  { %534 = vmatmul.msk.bf16.vlgmr.msra.gmra.mxu2 %vm89_vm0, %v127_v3  ;;  %532 = vmatmul.msk.bf16.vlgmr.msra.gmra.mxu0 %vm89_vm0, %v82_v6  ;;  %v335_v16 = vld [vmem:[#allocation2 + $0x48] sm:$0xff]  ;;  %v371_v17 = vpack.c.bf16 %v370_v14, %v369_v13  ;;  %s785_s12 = sld [smem:[#allocation9 + $0x200]] }
  0x1a   :  { %312 = vmatpush.bf16.msrb.mxu2 %v590_v0  ;;  %173 = vmatpush.bf16.msrb.mxu0 %v590_v0  ;;  %v336_v18 = vpack.c.bf16 %v335_v16, %v334_v15  ;;  %v79_v23 = vld [vmem:[#allocation8] sm:$0xf]  ;;  %s787_s13 = sld [smem:[#allocation9 + $0x280]] }
  0x1b   :  { %s789_s14 = sld [smem:[#allocation9 + $0x300]]  ;;  %v195_v39 = vstv %s777_s2  ;;  %s513_s2 = sshll.u32 %s971_s4, 4  ;;  %s514_s2 = int_to_ptr.hbm [resolvable:$true] %s513_s2 }
  0x1c   :  { %s791_s15 = sld [smem:[#allocation9 + $0x380]]  ;;  %v208_v40 = vstv %s779_s3 }
  0x1d   :  { %s793_s16 = sld [smem:[#allocation9 + $0x1]]  ;;  %v221_v41 = vstv %s781_s10 }
  0x1e   :  { %382 = vmatpush.bf16.msra.mxu2 %v590_v0  ;;  %347 = vmatpush.bf16.msra.mxu0 %v590_v0  ;;  %s795_s17 = sld [smem:[#allocation9 + $0x81]]  ;;  %v234_v42 = vstv %s783_s11 }
  0x1f   :  { %s797_s18 = sld [smem:[#allocation9 + $0x101]]  ;;  %v247_v43 = vstv %s785_s12 }
  0x20   :  { %s799_s19 = sld [smem:[#allocation9 + $0x181]]  ;;  %v260_v44 = vstv %s787_s13 }
  0x21   :  { %s801_s20 = sld [smem:[#allocation9 + $0x201]]  ;;  %v273_v45 = vstv %s789_s14 }
  0x22   :  { %s803_s21 = sld [smem:[#allocation9 + $0x281]]  ;;  %v286_v46 = vstv %s791_s15 }
  0x23   :  { %s805_s22 = sld [smem:[#allocation9 + $0x301]]  ;;  %v198_v47 = vstv %s793_s16 }
  0x24   :  { %s807_s23 = sld [smem:[#allocation9 + $0x381]]  ;;  %v211_v48 = vstv %s795_s17 }
  0x25   :  { %s809_s24 = sld [smem:[#allocation9 + $0x2]]  ;;  %v224_v49 = vstv %s797_s18 }
  0x26   :  { %s811_s25 = sld [smem:[#allocation9 + $0x82]]  ;;  %v237_v50 = vstv %s799_s19 }
  0x27   :  { %s813_s26 = sld [smem:[#allocation9 + $0x102]]  ;;  %v250_v52 = vstv %s801_s20 }
  0x28   :  { %s815_s1 = sld [smem:[#allocation9 + $0x182]]  ;;  %v263_v53 = vstv %s803_s21 }
  0x29   :  { %561 = vmatmul.msk.bf16.vlgmr.msrb.gmra.mxu2 %vm89_vm0, %v301_v11  ;;  %536 = vmatmul.msk.bf16.vlgmr.msrb.gmra.mxu0 %vm89_vm0, %v162_v12  ;;  %s817_s29 = sld [smem:[#allocation9 + $0x202]]  ;;  %v276_v54 = vstv %s805_s22 }
  0x2a   :  { %s819_s30 = sld [smem:[#allocation9 + $0x282]]  ;;  %v289_v55 = vstv %s807_s23 }
  0x2b   :  { %s821_s5 = sld [smem:[#allocation9 + $0x302]]  ;;  %v202_v56 = vstv %s809_s24 }
  0x2c   :  { %s823_s0 = sld [smem:[#allocation9 + $0x382]]  ;;  %v215_v57 = vstv %s811_s25 }
  0x2d   :  { %v228_v58 = vstv %s813_s26 }
  0x2e   :  { %v241_v59 = vstv %s815_s1 }
  0x2f   :  { %v254_v60 = vstv %s817_s29 }
  0x30   :  { %v267_v61 = vstv %s819_s30 }
  0x31   :  { %v280_v62 = vstv %s821_s5 }
  0x32   :  { %v293_v3 = vstv %s823_s0 }
  0x39   :  { %565 = vmatmul.msk.bf16.vlgmr.msra.gmra.mxu2 %vm89_vm0, %v371_v17  ;;  %563 = vmatmul.msk.bf16.vlgmr.msra.gmra.mxu0 %vm89_vm0, %v336_v18 }
  0x96   :  { %v102_v19 = vpop.f32.mrf.mxu0 }
  0x9c   :  { %v140_v20 = vpop.f32.mrf.mxu2 }
  0x9e   :  { %v104_v21 = vpop.f32.mrf.mxu0 }
  0x9f   :  { %v107_v22 = vpack.c.bf16 %v104_v21, %v102_v19 }
  0xa1   :  { %118 = vmatpush.bf16.msra.mxu1 %v107_v22 }
  0xa4   :  { %v142_v24 = vpop.f32.mrf.mxu2  ;;  %533 = vmatmul.msk.bf16.vlgmr.msra.gmra.mxu1 %vm89_vm0, %v79_v23 }
  0xa5   :  { %v145_v25 = vpack.c.bf16 %v142_v24, %v140_v20 }
  0xa6   :  { %v175_v26 = vpop.f32.mrf.mxu0 }
  0xa7   :  { %153 = vmatpush.bf16.msra.mxu3 %v145_v25 }
  0xaa   :  { %535 = vmatmul.msk.bf16.vlgmr.msra.gmra.mxu3 %vm89_vm0, %v79_v23 }
  0xac   :  { %v314_v27 = vpop.f32.mrf.mxu2 }
  0xae   :  { %v177_v28 = vpop.f32.mrf.mxu0 }
  0xaf   :  { %v180_v29 = vpack.c.bf16 %v177_v28, %v175_v26 }
  0xb1   :  { %188 = vmatpush.bf16.msrb.mxu1 %v180_v29 }
  0xb4   :  { %v316_v30 = vpop.f32.mrf.mxu2  ;;  %537 = vmatmul.msk.bf16.vlgmr.msrb.gmra.mxu1 %vm89_vm0, %v79_v23 }
  0xb5   :  { %v319_v31 = vpack.c.bf16 %v316_v30, %v314_v27 }
  0xb6   :  { %v349_v32 = vpop.f32.mrf.mxu0 }
  0xb7   :  { %327 = vmatpush.bf16.msrb.mxu3 %v319_v31 }
  0xba   :  { %562 = vmatmul.msk.bf16.vlgmr.msrb.gmra.mxu3 %vm89_vm0, %v79_v23 }
  0xbc   :  { %v384_v33 = vpop.f32.mrf.mxu2 }
  0xbe   :  { %v351_v34 = vpop.f32.mrf.mxu0 }
  0xbf   :  { %v354_v35 = vpack.c.bf16 %v351_v34, %v349_v32 }
  0xc1   :  { %362 = vmatpush.bf16.msra.mxu1 %v354_v35 }
  0xc4   :  { %v386_v36 = vpop.f32.mrf.mxu2  ;;  %564 = vmatmul.msk.bf16.vlgmr.msra.gmra.mxu1 %vm89_vm0, %v79_v23 }
  0xc5   :  { %v389_v37 = vpack.c.bf16 %v386_v36, %v384_v33 }
  0xc7   :  { %397 = vmatpush.bf16.msra.mxu3 %v389_v37 }
  0xca   :  { %566 = vmatmul.msk.bf16.vlgmr.msra.gmra.mxu3 %vm89_vm0, %v79_v23 }
 0x121   :  { %v120_v38 = vpop.f32.mrf.mxu1 }
 0x122   :  { %v196_v63 = vmul.f32 %v195_v39, %v120_v38  ;;  %v209_v0 = vmul.f32 %v208_v40, %v120_v38  ;;  %v222_v1 = vmul.f32 %v221_v41, %v120_v38  ;;  %v235_v4 = vmul.f32 %v234_v42, %v120_v38 }
 0x123   :  { %v248_v8 = vmul.f32 %v247_v43, %v120_v38  ;;  %v261_v9 = vmul.f32 %v260_v44, %v120_v38  ;;  %v274_v12 = vmul.f32 %v273_v45, %v120_v38  ;;  %v287_v13 = vmul.f32 %v286_v46, %v120_v38 }
 0x129   :  { %v122_v51 = vpop.f32.mrf.mxu1 }
 0x12d   :  { %v155_v2 = vpop.f32.mrf.mxu3 }
 0x12e   :  { %v199_v5 = vmul.f32 %v198_v47, %v155_v2  ;;  %v212_v6 = vmul.f32 %v211_v48, %v155_v2  ;;  %v225_v7 = vmul.f32 %v224_v49, %v155_v2  ;;  %v238_v10 = vmul.f32 %v237_v50, %v155_v2 }
 0x12f   :  { %v251_v11 = vmul.f32 %v250_v52, %v155_v2  ;;  %v264_v14 = vmul.f32 %v263_v53, %v155_v2  ;;  %v277_v15 = vmul.f32 %v276_v54, %v155_v2  ;;  %v290_v19 = vmul.f32 %v289_v55, %v155_v2 }
 0x130   :  { %v200_v16 = vadd.f32 %v199_v5, %v196_v63  ;;  %v213_v17 = vadd.f32 %v212_v6, %v209_v0  ;;  %v226_v18 = vadd.f32 %v225_v7, %v222_v1  ;;  %v239_v25 = vadd.f32 %v238_v10, %v235_v4 }
 0x131   :  { %v190_v20 = vpop.f32.mrf.mxu1  ;;  %v252_v26 = vadd.f32 %v251_v11, %v248_v8  ;;  %v265_v33 = vadd.f32 %v264_v14, %v261_v9  ;;  %v278_v37 = vadd.f32 %v277_v15, %v274_v12  ;;  %v291_v51 = vadd.f32 %v290_v19, %v287_v13 }
 0x132   :  { %v203_v21 = vmul.f32 %v202_v56, %v190_v20  ;;  %v216_v22 = vmul.f32 %v215_v57, %v190_v20  ;;  %v229_v23 = vmul.f32 %v228_v58, %v190_v20  ;;  %v242_v24 = vmul.f32 %v241_v59, %v190_v20 }
 0x133   :  { %v255_v27 = vmul.f32 %v254_v60, %v190_v20  ;;  %v268_v28 = vmul.f32 %v267_v61, %v190_v20  ;;  %v281_v32 = vmul.f32 %v280_v62, %v190_v20  ;;  %v294_v36 = vmul.f32 %v293_v3, %v190_v20 }
 0x134   :  { %v204_v29 = vadd.f32 %v203_v21, %v200_v16  ;;  %v217_v30 = vadd.f32 %v216_v22, %v213_v17  ;;  %v230_v31 = vadd.f32 %v229_v23, %v226_v18  ;;  %v243_v35 = vadd.f32 %v242_v24, %v239_v25 }
 0x135   :  { %v157_v34 = vpop.f32.mrf.mxu3  ;;  %v256_v38 = vadd.f32 %v255_v27, %v252_v26  ;;  %v269_v63 = vadd.f32 %v268_v28, %v265_v33  ;;  %v282_v0 = vadd.f32 %v281_v32, %v278_v37  ;;  %v295_v1 = vadd.f32 %v294_v36, %v291_v51 }
 0x136   :  { %206 = vst.msk [vmem:[#allocation10] sm:$0xff] %vm205_vm1, %v204_v29 }
 0x137   :  { %219 = vst.msk [vmem:[#allocation10 + $0x8] sm:$0xff] %vm205_vm1, %v217_v30 }
 0x138   :  { %232 = vst.msk [vmem:[#allocation10 + $0x10] sm:$0xff] %vm205_vm1, %v230_v31 }
 0x139   :  { %245 = vst.msk [vmem:[#allocation10 + $0x18] sm:$0xff] %vm205_vm1, %v243_v35  ;;  %v192_v2 = vpop.f32.mrf.mxu1 }
 0x13a   :  { %258 = vst.msk [vmem:[#allocation10 + $0x20] sm:$0xff] %vm205_vm1, %v256_v38 }
 0x13b   :  { %271 = vst.msk [vmem:[#allocation10 + $0x28] sm:$0xff] %vm205_vm1, %v269_v63 }
 0x13c   :  { %284 = vst.msk [vmem:[#allocation10 + $0x30] sm:$0xff] %vm205_vm1, %v282_v0 }
 0x13d   :  { %297 = vst.msk [vmem:[#allocation10 + $0x38] sm:$0xff] %vm205_vm1, %v295_v1  ;;  %v329_v4 = vpop.f32.mrf.mxu3 }
 0x13e   :  { %v405_v11 = vmul.f32 %v329_v4, %v195_v39  ;;  %v418_v12 = vmul.f32 %v329_v4, %v208_v40  ;;  %v431_v13 = vmul.f32 %v329_v4, %v221_v41  ;;  %v444_v14 = vmul.f32 %v329_v4, %v234_v42 }
 0x13f   :  { %v470_v15 = vmul.f32 %v329_v4, %v260_v44  ;;  %v483_v39 = vmul.f32 %v329_v4, %v273_v45  ;;  %v496_v24 = vmul.f32 %v329_v4, %v286_v46 }
 0x141   :  { %v364_v5 = vpop.f32.mrf.mxu1 }
 0x142   :  { %v408_v7 = vmul.f32 %v364_v5, %v198_v47  ;;  %v421_v8 = vmul.f32 %v364_v5, %v211_v48  ;;  %v434_v9 = vmul.f32 %v364_v5, %v224_v49  ;;  %v457_v47 = vmul.f32 %v329_v4, %v247_v43 }
 0x143   :  { %v447_v48 = vmul.f32 %v364_v5, %v237_v50  ;;  %v460_v49 = vmul.f32 %v364_v5, %v250_v52  ;;  %v473_v40 = vmul.f32 %v364_v5, %v263_v53  ;;  %v486_v41 = vmul.f32 %v364_v5, %v276_v54 }
 0x144   :  { %v409_v16 = vadd.f32 %v408_v7, %v405_v11  ;;  %v422_v42 = vadd.f32 %v421_v8, %v418_v12  ;;  %v435_v17 = vadd.f32 %v434_v9, %v431_v13  ;;  %v499_v43 = vmul.f32 %v364_v5, %v289_v55 }
 0x145   :  { %v331_v6 = vpop.f32.mrf.mxu3  ;;  %v448_v53 = vadd.f32 %v447_v48, %v444_v14  ;;  %v461_v19 = vadd.f32 %v460_v49, %v457_v47 }
 0x146   :  { %v500_v26 = vadd.f32 %v499_v43, %v496_v24 }
 0x149   :  { %v366_v10 = vpop.f32.mrf.mxu1 }
 0x14d   :  { %v399_v50 = vpop.f32.mrf.mxu3 }
 0x14e   :  { %v412_v52 = vmul.f32 %v399_v50, %v202_v56  ;;  %v425_v44 = vmul.f32 %v399_v50, %v215_v57  ;;  %v438_v18 = vmul.f32 %v399_v50, %v228_v58  ;;  %v451_v45 = vmul.f32 %v399_v50, %v241_v59 }
 0x14f   :  { %v464_v54 = vmul.f32 %v399_v50, %v254_v60  ;;  %v477_v20 = vmul.f32 %v399_v50, %v267_v61  ;;  %v490_v55 = vmul.f32 %v399_v50, %v280_v62  ;;  %v474_v56 = vadd.f32 %v473_v40, %v470_v15 }
 0x150   :  { %v413_v21 = vadd.f32 %v412_v52, %v409_v16  ;;  %v426_v22 = vadd.f32 %v425_v44, %v422_v42  ;;  %v439_v23 = vadd.f32 %v438_v18, %v435_v17  ;;  %v452_v25 = vadd.f32 %v451_v45, %v448_v53 }
 0x151   :  { %v503_v57 = vmul.f32 %v399_v50, %v293_v3  ;;  %v487_v58 = vadd.f32 %v486_v41, %v483_v39  ;;  %v465_v59 = vadd.f32 %v464_v54, %v461_v19  ;;  %v478_v60 = vadd.f32 %v477_v20, %v474_v56 }
 0x152   :  { %415 = vst.msk [vmem:[#allocation10 + $0x40] sm:$0xff] %vm205_vm1, %v413_v21 }
 0x153   :  { %428 = vst.msk [vmem:[#allocation10 + $0x48] sm:$0xff] %vm205_vm1, %v426_v22  ;;  %v491_v61 = vadd.f32 %v490_v55, %v487_v58  ;;  %v504_v46 = vadd.f32 %v503_v57, %v500_v26 }
 0x154   :  { %441 = vst.msk [vmem:[#allocation10 + $0x50] sm:$0xff] %vm205_vm1, %v439_v23 }
 0x155   :  { %454 = vst.msk [vmem:[#allocation10 + $0x58] sm:$0xff] %vm205_vm1, %v452_v25  ;;  %v401_v62 = vpop.f32.mrf.mxu3 }
 0x156   :  { %467 = vst.msk [vmem:[#allocation10 + $0x60] sm:$0xff] %vm205_vm1, %v465_v59 }
 0x157   :  { %480 = vst.msk [vmem:[#allocation10 + $0x68] sm:$0xff] %vm205_vm1, %v478_v60 }
 0x158   :  { %493 = vst.msk [vmem:[#allocation10 + $0x70] sm:$0xff] %vm205_vm1, %v491_v61 }
 0x159   :  { %506 = vst.msk [vmem:[#allocation10 + $0x78] sm:$0xff] %vm205_vm1, %v504_v46 }
 0x15a   :  { %519 = dma.vmem_to_hbm [thread:$0]  %s512_s7, 2048, %s514_s2, [#allocation4], %s720_s27, %s720_s27, %s721_s28  }
 0x15b   :  { %714 = dma.done.wait [#allocation4], 2048  }
 0x15c   :  { %715 = vsyncadd [#allocation4], 4294965248 }
 0x15d   :  { %524 = vsyncpa [#allocation3], 1 }
 0x15e   :  { %525 = vsyncpa [#allocation7], 1 }
 0x15f   :  { %526 = vsyncpa [#allocation4], 1 }
 0x160   :  { %527 = vsyncpa [#allocation5], 1 }

</bundles_post_ra>
